<compile_context>
chip_gen: v7x
topology: tpu7x:2x2x1
jax: 0.10.0
libtpu: 0.0.40
codegen_flags: <defaults>
</compile_context>

<pallas_src>
import functools
import math

import numpy as np
import jax
import jax.numpy as jnp
from jax.experimental import pallas as pl
from jax.experimental.pallas import tpu as pltpu


# --------------------------------------------------------------------------
# Pallas kernel: FM term + MLP tower + (prefolded) linear term + sigmoid
# Batch lives in the lane dimension (TB lanes per grid step).
# --------------------------------------------------------------------------
def deepfm_kernel(num_fields, embed_dim,
                  lin_ref, embT_ref,
                  w1T_ref, b1_ref, w2T_ref, b2_ref, w3_ref,
                  bias_ref, out_ref):
    # embT_ref: (FE_pad, TB) bf16 (only the first F*E rows are real data)
    # lin_ref:  (1, TB) f32 — linear term, already summed over fields in XLA
    E = embed_dim

    # ---- FM (FactorizationLayer, reduce_sum=True): 0.5*((sum e)^2 - sum e^2)
    # Cast each field slice straight from the VMEM ref (keeps f32 live state
    # at ~E rows + 2 accumulators; vld slots have plenty of slack here).
    e0 = embT_ref[0:E, :].astype(jnp.float32)
    sum_f = e0
    sum_sq = e0 * e0
    for f in range(1, num_fields):                     # static unrolled loop
        ef = embT_ref[f * E:(f + 1) * E, :].astype(jnp.float32)
        sum_f = sum_f + ef
        sum_sq = sum_sq + ef * ef
    fm = 0.5 * jnp.sum(sum_f * sum_f - sum_sq, axis=0, keepdims=True)  # (1, TB)

    # ---- MLP tower: bf16 matmuls, f32 accumulation, batch stays in lanes
    h = jnp.dot(w1T_ref[...], embT_ref[...],
                preferred_element_type=jnp.float32) + b1_ref[...]      # (H1, TB)
    h = jnp.maximum(h, 0.0)
    h = jnp.dot(w2T_ref[...], h.astype(jnp.bfloat16),
                preferred_element_type=jnp.float32) + b2_ref[...]      # (H2, TB)
    h = jnp.maximum(h, 0.0)
    # N=1 output layer as VPU multiply + sublane reduce (keeps lanes dense)
    mlp = jnp.sum(h * w3_ref[...], axis=0, keepdims=True)              # (1, TB)

    logits = lin_ref[...] + fm + mlp + bias_ref[0]     # folded scalar biases (SMEM)
    out_ref[...] = jax.nn.sigmoid(logits)              # lane-dense (1, TB) store


def _pick_tile(batch, tile_b):
    """Lane-multiple batch tile; prefer >=2 grid steps (v7x second TC)."""
    b128 = ((batch + 127) // 128) * 128
    tb = min(tile_b, b128)
    if b128 >= 256 and b128 // tb < 2:
        tb = max(128, ((b128 // 2) // 128) * 128)
    return tb


# --------------------------------------------------------------------------
# Wrapper: lane-dense embedding gather (XLA glue) + pallas_call
# --------------------------------------------------------------------------
def deepfm_forward(params, x_user, x_item, x_context,
                   user_hist=None, hist_len=None, klg=None, *, tile_b=512):
    # DeepFM ignores user_hist / hist_len / klg in its forward pass.
    x = jnp.concatenate([x_user, x_item, x_context], axis=1)    # (B, F) int32
    B, F = x.shape
    E = params["emb"].shape[1]
    FE = F * E
    FE_pad = ((FE + 127) // 128) * 128                 # 128-aligned MXU K dim
    H1 = params["w1"].shape[1]
    H2 = params["w2"].shape[1]

    TB = _pick_tile(B, tile_b)
    num_tiles = pl.cdiv(B, TB)
    B_pad = num_tiles * TB
    pad = B_pad - B
    x_pad = jnp.pad(x, ((0, pad), (0, 0))) if pad else x

    # bf16 embedding gather directly into the lane-dense (FE_pad, B_pad)
    # layout: per-field take on the pre-transposed (E, vocab) table, then a
    # single concat (which also appends the FE->FE_pad zero rows for free).
    embT_table = params["emb"].astype(jnp.bfloat16).T            # (E, vocab)
    cols = [jnp.take(embT_table, x_pad[:, f], axis=1) for f in range(F)]
    if FE_pad > FE:
        cols.append(jnp.zeros((FE_pad - FE, B_pad), jnp.bfloat16))
    embT = jnp.concatenate(cols, axis=0)                          # (FE_pad, B_pad)

    # Linear term folded in XLA: sum of per-index weights, lane-dense (1, B_pad)
    lin = jnp.sum(jnp.take(params["w_lin"][:, 0], x_pad, axis=0),
                  axis=1).reshape(1, B_pad).astype(jnp.float32)

    w1T = jnp.pad(params["w1"].T.astype(jnp.bfloat16),
                  ((0, 0), (0, FE_pad - FE)))          # (H1, FE_pad) bf16
    b1 = params["b1"].reshape(H1, 1).astype(jnp.float32)
    w2T = params["w2"].T.astype(jnp.bfloat16)          # (H2, H1) bf16
    b2 = params["b2"].reshape(H2, 1).astype(jnp.float32)
    w3 = params["w3"].astype(jnp.float32)              # (H2, 1) f32
    bias = (params["b_lin"] + params["b3"]).reshape(1).astype(jnp.float32)

    kernel = functools.partial(deepfm_kernel, F, E)

    in_specs = [
        pl.BlockSpec((1, TB), lambda i: (0, i)),       # lin (prefolded)
        pl.BlockSpec((FE_pad, TB), lambda i: (0, i)),  # embT
        pl.BlockSpec((H1, FE_pad), lambda i: (0, 0)),  # w1T (resident)
        pl.BlockSpec((H1, 1), lambda i: (0, 0)),       # b1
        pl.BlockSpec((H2, H1), lambda i: (0, 0)),      # w2T
        pl.BlockSpec((H2, 1), lambda i: (0, 0)),       # b2
        pl.BlockSpec((H2, 1), lambda i: (0, 0)),       # w3
        pl.BlockSpec(memory_space=pltpu.MemorySpace.SMEM),   # folded scalar bias
    ]

    # Advisory cost hint so XLA schedules the gather against the kernel.
    flops = (2 * B_pad * (H1 * FE_pad + H2 * H1)            # MXU
             + B_pad * (4 * FE + 2 * E + H1 + 3 * H2 + 4))  # VPU (approx)
    bytes_accessed = (embT.size * 2 + lin.size * 4
                      + (w1T.size + w2T.size) * 2
                      + (b1.size + b2.size + w3.size) * 4
                      + B_pad * 4)
    cost = pl.CostEstimate(flops=int(flops), transcendentals=int(B_pad),
                           bytes_accessed=int(bytes_accessed))

    out = pl.pallas_call(
        kernel,
        grid=(num_tiles,),
        in_specs=in_specs,
        out_specs=pl.BlockSpec((1, TB), lambda i: (0, i)),   # lane-dense output
        out_shape=jax.ShapeDtypeStruct((1, B_pad), jnp.float32),
        compiler_params=pltpu.CompilerParams(
            dimension_semantics=("parallel",),
            vmem_limit_bytes=32 * 1024 * 1024,        # explicit: safe on v5e/v6e/v7x
        ),
        cost_estimate=cost,
    )(lin, embT, w1T, b1, w2T, b2, w3, bias)

    return out[0, :B]


# --------------------------------------------------------------------------
# Pure-JAX reference with the same precision choices (bf16 MXU, f32 accum)
# --------------------------------------------------------------------------
def reference_forward(params, x_user, x_item, x_context, *_unused):
    x = jnp.concatenate([x_user, x_item, x_context], axis=1)
    B, F = x.shape
    E = params["emb"].shape[1]

    emb = jnp.take(params["emb"].astype(jnp.bfloat16), x, axis=0)     # (B, F, E)
    e32 = emb.astype(jnp.float32)

    lin = jnp.sum(jnp.take(params["w_lin"][:, 0], x, axis=0), axis=1) + params["b_lin"]

    sum_f = jnp.sum(e32, axis=1)
    sum_sq = jnp.sum(e32 * e32, axis=1)
    fm = 0.5 * jnp.sum(sum_f * sum_f - sum_sq, axis=1)

    h = emb.reshape(B, F * E)
    h = jnp.maximum(jnp.dot(h, params["w1"].astype(jnp.bfloat16),
                            preferred_element_type=jnp.float32) + params["b1"], 0.0)
    h = jnp.maximum(jnp.dot(h.astype(jnp.bfloat16), params["w2"].astype(jnp.bfloat16),
                            preferred_element_type=jnp.float32) + params["b2"], 0.0)
    mlp = h @ params["w3"][:, 0] + params["b3"]

    return jax.nn.sigmoid(lin + fm + mlp)


# --------------------------------------------------------------------------
# Deterministic parameter init + example run
# --------------------------------------------------------------------------
def make_params(key, vocab, E, num_fields, hidden_dims):
    H1, H2 = hidden_dims
    FE = num_fields * E
    ks = jax.random.split(key, 8)

    def lin_init(k, fan_in, shape):
        b = 1.0 / math.sqrt(fan_in)
        return jax.random.uniform(k, shape, jnp.float32, -b, b)

    return {
        "emb":   jax.random.normal(ks[0], (vocab, E), jnp.float32) * 0.1,
        "w_lin": jax.random.normal(ks[1], (vocab, 1), jnp.float32) * 0.1,
        "b_lin": jnp.zeros((), jnp.float32),          # matches torch.zeros bias
        "w1":    lin_init(ks[2], FE, (FE, H1)),
        "b1":    lin_init(ks[3], FE, (H1,)),
        "w2":    lin_init(ks[4], H1, (H1, H2)),
        "b2":    lin_init(ks[5], H1, (H2,)),
        "w3":    lin_init(ks[6], H2, (H2, 1)),
        "b3":    lin_init(ks[7], H2, ()),
    }


if __name__ == "__main__":
    # Small shapes consistent with the module.  B is not a multiple of 128 on
    # purpose, to exercise the pad/slice path; the tile picker gives TB=128
    # and a 2-step "parallel" grid (pipelining / v7x second TC).
    B = 200
    vocab = 100
    E = 16
    user_f, item_f, ctx_f = 2, 2, 1
    F = user_f + item_f + ctx_f
    hidden_dims = (64, 32)
    T, hist_f, klg_dim = 8, 2, 8      # unused by DeepFM.forward, kept for the signature

    key = jax.random.PRNGKey(0)
    k_par, k_u, k_i, k_c, k_h, k_l, k_k = jax.random.split(key, 7)

    params = make_params(k_par, vocab, E, F, hidden_dims)

    x_user = jax.random.randint(k_u, (B, user_f), 0, vocab, jnp.int32)
    x_item = jax.random.randint(k_i, (B, item_f), 0, vocab, jnp.int32)
    x_context = jax.random.randint(k_c, (B, ctx_f), 0, vocab, jnp.int32)
    user_hist = jax.random.randint(k_h, (B, T, hist_f), 0, vocab, jnp.int32)
    hist_len = jax.random.randint(k_l, (B,), 1, T + 1, jnp.int32)
    klg = jax.random.normal(k_k, (B, klg_dim), jnp.float32)

    pred = deepfm_forward(params, x_user, x_item, x_context,
                          user_hist, hist_len, klg)
    pred = jax.block_until_ready(pred)

    ref = reference_forward(params, x_user, x_item, x_context,
                            user_hist, hist_len, klg)
    np.testing.assert_allclose(np.asarray(pred), np.asarray(ref),
                               rtol=1e-3, atol=1e-4)

    print("KERNEL_OK")
</pallas_src>

<mosaic_0001>
module attributes {stable_mosaic.version = 11 : i64} {
  func.func @deepfm_kernel(%arg0: i32, %arg1: memref<1x128xf32, #tpu.memory_space<vmem>>, %arg2: memref<128x128xbf16, #tpu.memory_space<vmem>>, %arg3: memref<64x128xbf16, #tpu.memory_space<vmem>>, %arg4: memref<64x1xf32, #tpu.memory_space<vmem>>, %arg5: memref<32x64xbf16, #tpu.memory_space<vmem>>, %arg6: memref<32x1xf32, #tpu.memory_space<vmem>>, %arg7: memref<32x1xf32, #tpu.memory_space<vmem>>, %arg8: memref<1xf32, #tpu.memory_space<smem>>, %arg9: memref<1x128xf32, #tpu.memory_space<vmem>>) attributes {dimension_semantics = [#tpu.dimension_semantics<parallel>], iteration_bounds = array<i64: 2>, scalar_prefetch = 0 : i64, scratch_operands = 0 : i64, tpu.core_type = #tpu.core_type<tc>, window_params = [{transform_indices = @transform_0, window_bounds = array<i64: 1, 128>}, {transform_indices = @transform_1, window_bounds = array<i64: 128, 128>}, {pipeline_mode = #tpu.pipeline_mode<synchronous>, transform_indices = @transform_2, window_bounds = array<i64: 64, 128>}, {pipeline_mode = #tpu.pipeline_mode<synchronous>, transform_indices = @transform_3, window_bounds = array<i64: 64, 1>}, {pipeline_mode = #tpu.pipeline_mode<synchronous>, transform_indices = @transform_4, window_bounds = array<i64: 32, 64>}, {pipeline_mode = #tpu.pipeline_mode<synchronous>, transform_indices = @transform_5, window_bounds = array<i64: 32, 1>}, {pipeline_mode = #tpu.pipeline_mode<synchronous>, transform_indices = @transform_6, window_bounds = array<i64: 32, 1>}, {transform_indices = @transform_7, window_bounds = array<i64: 1>}, {transform_indices = @transform_8, window_bounds = array<i64: 1, 128>}]} {
    %c0 = arith.constant 0 : index
    %c0_0 = arith.constant 0 : index
    %0 = vector.load %arg2[%c0, %c0_0] : memref<128x128xbf16, #tpu.memory_space<vmem>>, vector<16x128xbf16>
    %1 = arith.extf %0 : vector<16x128xbf16> to vector<16x128xf32>
    %2 = arith.mulf %1, %1 : vector<16x128xf32>
    %c16 = arith.constant 16 : index
    %c0_1 = arith.constant 0 : index
    %3 = vector.load %arg2[%c16, %c0_1] : memref<128x128xbf16, #tpu.memory_space<vmem>>, vector<16x128xbf16>
    %4 = arith.extf %3 : vector<16x128xbf16> to vector<16x128xf32>
    %5 = arith.addf %1, %4 : vector<16x128xf32>
    %6 = arith.mulf %4, %4 : vector<16x128xf32>
    %7 = arith.addf %2, %6 : vector<16x128xf32>
    %c32 = arith.constant 32 : index
    %c0_2 = arith.constant 0 : index
    %8 = vector.load %arg2[%c32, %c0_2] : memref<128x128xbf16, #tpu.memory_space<vmem>>, vector<16x128xbf16>
    %9 = arith.extf %8 : vector<16x128xbf16> to vector<16x128xf32>
    %10 = arith.addf %5, %9 : vector<16x128xf32>
    %11 = arith.mulf %9, %9 : vector<16x128xf32>
    %12 = arith.addf %7, %11 : vector<16x128xf32>
    %c48 = arith.constant 48 : index
    %c0_3 = arith.constant 0 : index
    %13 = vector.load %arg2[%c48, %c0_3] : memref<128x128xbf16, #tpu.memory_space<vmem>>, vector<16x128xbf16>
    %14 = arith.extf %13 : vector<16x128xbf16> to vector<16x128xf32>
    %15 = arith.addf %10, %14 : vector<16x128xf32>
    %16 = arith.mulf %14, %14 : vector<16x128xf32>
    %17 = arith.addf %12, %16 : vector<16x128xf32>
    %c64 = arith.constant 64 : index
    %c0_4 = arith.constant 0 : index
    %18 = vector.load %arg2[%c64, %c0_4] : memref<128x128xbf16, #tpu.memory_space<vmem>>, vector<16x128xbf16>
    %19 = arith.extf %18 : vector<16x128xbf16> to vector<16x128xf32>
    %20 = arith.addf %15, %19 : vector<16x128xf32>
    %21 = arith.mulf %19, %19 : vector<16x128xf32>
    %22 = arith.addf %17, %21 : vector<16x128xf32>
    %23 = arith.mulf %20, %20 : vector<16x128xf32>
    %24 = arith.subf %23, %22 : vector<16x128xf32>
    %cst = arith.constant dense<0.000000e+00> : vector<128xf32>
    %25 = vector.multi_reduction <add>, %24, %cst [0] : vector<16x128xf32> to vector<128xf32>
    %26 = vector.shape_cast %25 : vector<128xf32> to vector<1x128xf32>
    %cst_5 = arith.constant 5.000000e-01 : f32
    %27 = vector.broadcast %cst_5 : f32 to vector<1x128xf32>
    %28 = arith.mulf %27, %26 : vector<1x128xf32>
    %c0_6 = arith.constant 0 : index
    %c0_7 = arith.constant 0 : index
    %29 = vector.load %arg3[%c0_6, %c0_7] : memref<64x128xbf16, #tpu.memory_space<vmem>>, vector<64x128xbf16>
    %c0_8 = arith.constant 0 : index
    %c0_9 = arith.constant 0 : index
    %30 = vector.load %arg2[%c0_8, %c0_9] : memref<128x128xbf16, #tpu.memory_space<vmem>>, vector<128x128xbf16>
    %cst_10 = arith.constant dense<0.000000e+00> : vector<64x128xf32>
    %31 = tpu.matmul %29, %30, %cst_10 {dimension_numbers = #tpu.dot_dimension_numbers<[1], [0], [0], [1], [0, 0, 1, 1], [], []>} : vector<64x128xbf16>, vector<128x128xbf16>, vector<64x128xf32> -> vector<64x128xf32>
    %c0_11 = arith.constant 0 : index
    %c0_12 = arith.constant 0 : index
    %32 = vector.load %arg4[%c0_11, %c0_12] : memref<64x1xf32, #tpu.memory_space<vmem>>, vector<64x1xf32>
    %33 = vector.broadcast %32 : vector<64x1xf32> to vector<64x128xf32>
    %34 = arith.addf %31, %33 : vector<64x128xf32>
    %cst_13 = arith.constant 0.000000e+00 : f32
    %35 = vector.broadcast %cst_13 : f32 to vector<64x128xf32>
    %36 = arith.maximumf %34, %35 : vector<64x128xf32>
    %c0_14 = arith.constant 0 : index
    %c0_15 = arith.constant 0 : index
    %37 = vector.load %arg5[%c0_14, %c0_15] : memref<32x64xbf16, #tpu.memory_space<vmem>>, vector<32x64xbf16>
    %38 = arith.truncf %36 : vector<64x128xf32> to vector<64x128xbf16>
    %cst_16 = arith.constant dense<0.000000e+00> : vector<32x128xf32>
    %39 = tpu.matmul %37, %38, %cst_16 {dimension_numbers = #tpu.dot_dimension_numbers<[1], [0], [0], [1], [0, 0, 1, 1], [], []>} : vector<32x64xbf16>, vector<64x128xbf16>, vector<32x128xf32> -> vector<32x128xf32>
    %c0_17 = arith.constant 0 : index
    %c0_18 = arith.constant 0 : index
    %40 = vector.load %arg6[%c0_17, %c0_18] : memref<32x1xf32, #tpu.memory_space<vmem>>, vector<32x1xf32>
    %41 = vector.broadcast %40 : vector<32x1xf32> to vector<32x128xf32>
    %42 = arith.addf %39, %41 : vector<32x128xf32>
    %cst_19 = arith.constant 0.000000e+00 : f32
    %43 = vector.broadcast %cst_19 : f32 to vector<32x128xf32>
    %44 = arith.maximumf %42, %43 : vector<32x128xf32>
    %c0_20 = arith.constant 0 : index
    %c0_21 = arith.constant 0 : index
    %45 = vector.load %arg7[%c0_20, %c0_21] : memref<32x1xf32, #tpu.memory_space<vmem>>, vector<32x1xf32>
    %46 = vector.broadcast %45 : vector<32x1xf32> to vector<32x128xf32>
    %47 = arith.mulf %44, %46 : vector<32x128xf32>
    %cst_22 = arith.constant dense<0.000000e+00> : vector<128xf32>
    %48 = vector.multi_reduction <add>, %47, %cst_22 [0] : vector<32x128xf32> to vector<128xf32>
    %49 = vector.shape_cast %48 : vector<128xf32> to vector<1x128xf32>
    %c0_23 = arith.constant 0 : index
    %c0_24 = arith.constant 0 : index
    %50 = vector.load %arg1[%c0_23, %c0_24] : memref<1x128xf32, #tpu.memory_space<vmem>>, vector<1x128xf32>
    %51 = arith.addf %50, %28 : vector<1x128xf32>
    %52 = arith.addf %51, %49 : vector<1x128xf32>
    %c0_25 = arith.constant 0 : index
    %53 = memref.load %arg8[%c0_25] : memref<1xf32, #tpu.memory_space<smem>>
    %54 = vector.broadcast %53 : f32 to vector<1x128xf32>
    %55 = arith.addf %52, %54 : vector<1x128xf32>
    %56 = arith.negf %55 : vector<1x128xf32>
    %57 = math.exp %56 : vector<1x128xf32>
    %cst_26 = arith.constant 1.000000e+00 : f32
    %58 = vector.broadcast %cst_26 : f32 to vector<1x128xf32>
    %59 = arith.addf %58, %57 : vector<1x128xf32>
    %60 = arith.divf %58, %59 : vector<1x128xf32>
    %c0_27 = arith.constant 0 : index
    %c0_28 = arith.constant 0 : index
    %61 = vector.load %arg9[%c0_27, %c0_28] : memref<1x128xf32, #tpu.memory_space<vmem>>, vector<1x128xf32>
    tpu.vector_store %arg9[%c0_27, %c0_28], %60 {strides = array<i32>} : memref<1x128xf32, #tpu.memory_space<vmem>>, vector<1x128xf32>,
    return
  }
  func.func @transform_0(%arg0: i32) -> (i32, i32) {
    %c0_i32 = arith.constant 0 : i32
    %c0_i32_0 = arith.constant 0 : i32
    return %c0_i32, %arg0 : i32, i32
  }
  func.func @transform_1(%arg0: i32) -> (i32, i32) {
    %c0_i32 = arith.constant 0 : i32
    %c0_i32_0 = arith.constant 0 : i32
    return %c0_i32, %arg0 : i32, i32
  }
  func.func @transform_2(%arg0: i32) -> (i32, i32) {
    %c0_i32 = arith.constant 0 : i32
    %c0_i32_0 = arith.constant 0 : i32
    %c0_i32_1 = arith.constant 0 : i32
    return %c0_i32, %c0_i32_0 : i32, i32
  }
  func.func @transform_3(%arg0: i32) -> (i32, i32) {
    %c0_i32 = arith.constant 0 : i32
    %c0_i32_0 = arith.constant 0 : i32
    %c0_i32_1 = arith.constant 0 : i32
    return %c0_i32, %c0_i32_0 : i32, i32
  }
  func.func @transform_4(%arg0: i32) -> (i32, i32) {
    %c0_i32 = arith.constant 0 : i32
    %c0_i32_0 = arith.constant 0 : i32
    %c0_i32_1 = arith.constant 0 : i32
    return %c0_i32, %c0_i32_0 : i32, i32
  }
  func.func @transform_5(%arg0: i32) -> (i32, i32) {
    %c0_i32 = arith.constant 0 : i32
    %c0_i32_0 = arith.constant 0 : i32
    %c0_i32_1 = arith.constant 0 : i32
    return %c0_i32, %c0_i32_0 : i32, i32
  }
  func.func @transform_6(%arg0: i32) -> (i32, i32) {
    %c0_i32 = arith.constant 0 : i32
    %c0_i32_0 = arith.constant 0 : i32
    %c0_i32_1 = arith.constant 0 : i32
    return %c0_i32, %c0_i32_0 : i32, i32
  }
  func.func @transform_7(%arg0: i32) -> i32 {
    %c0_i32 = arith.constant 0 : i32
    %c0_i32_0 = arith.constant 0 : i32
    return %c0_i32 : i32
  }
  func.func @transform_8(%arg0: i32) -> (i32, i32) {
    %c0_i32 = arith.constant 0 : i32
    %c0_i32_0 = arith.constant 0 : i32
    return %c0_i32, %arg0 : i32, i32
  }
}

</mosaic_0001>

<bundles_post_ra>
// kernel: tpu_custom_call.1
= control target key start
LH: loop header
LB: loop body
LE: loop exit
PB: predicated region body
PF: predicated region fallthrough
CT: control target
= control target key end

     0   :  { %s1553_s0 = inlined_call_operand.vmem [shape: f32[1,256], index: 0, kind: input, shape index: {}]   ;;  %s1554_s1 = inlined_call_operand.vmem [shape: bf16[128,256], index: 1, kind: input, shape index: {}]   ;;  %s1555_s2 = inlined_call_operand.hbm [shape: bf16[64,128], index: 2, kind: input, shape index: {}]   ;;  %s1556_s3 = inlined_call_operand.vmem [shape: f32[64,1], index: 3, kind: input, shape index: {}]   ;;  %s1557_s4 = inlined_call_operand.vmem [shape: bf16[32,64], index: 4, kind: input, shape index: {}]   ;;  %s1558_s5 = inlined_call_operand.vmem [shape: f32[32,1], index: 5, kind: input, shape index: {}]   ;;  %s1559_s6 = inlined_call_operand.vmem [shape: f32[32,1], index: 6, kind: input, shape index: {}]   ;;  %s1560_s7 = inlined_call_operand.<no memory space> [shape: f32[1], index: 7, kind: input, shape index: {}]   ;;  %s1561_s8 = inlined_call_operand.hbm [shape: f32[1,256], index: 8, kind: output, shape index: {}]  }
   0x1   :  { %13 = sst [smem:[#allocation2]] %s1560_s7 }
   0x2   :  { %14 = vsyncpa [#allocation5], 0 }
   0x3   :  { %15 = vsyncpa [#allocation6], 0 }
   0x4   :  { %17 = vsyncpa [#allocation6 + $0x1], 0  ;;  %s1308_s29 = smov 0   ;;  %s1310_s30 = smov 0  }
   0x5   :  { %s1312_s9 = smov 0   ;;  %s1314_s10 = smov 0  }
   0x6 LB: > { %s1329_s7 = sadd.s32 4294967295, %s1252_s10   ;;  %s957_s11 = sadd.s32 4294967294, %s1252_s10   ;;  %s1252_s10 = sphi %s1314_s10, %s1579_s10   ;;  %s1248_s9 = sphi %s1312_s9, %s1578_s9   ;;  %s1244_s30 = sphi %s1310_s30, %s1577_s30   ;;  %s1240_s29 = sphi %s1308_s29, %s1576_s29  }
   0x7   : > { %s1333_s12 = sadd.s32 1, %s1252_s10   ;;  %s56_s13 = sadd.s32 1, %s1248_s9 }
   0x8   : > { %s53_s14 = ssub.s32 %s1252_s10, %s1333_s12  ;;  %p63_p0 = scmp.ne.s32.totalorder %s1248_s9, %s1244_s30 }
   0x9   : > { %p54_p1 = scmp.eq.s32.totalorder %s53_s14, 0  ;;  %p64_p2 = scmp.eq.s32.totalorder %s1252_s10, 0 }
   0xa   : > { %p219_p3 = scmp.eq.s32.totalorder %s1329_s7, 1  ;;  %p224_p4 = scmp.ne.s32.totalorder %s1244_s30, %s1240_s29 }
   0xb   : > { %s1345_s15 = scalar_select %p54_p1, %s1248_s9, %s56_s13  }
   0xc   : > { %p1347_p5 = por %p64_p2, %p63_p0  ;;  %p1351_p6 = por %p219_p3, %p63_p0 }
   0xd   : > { %p225_p7 = scmp.eq.s32.totalorder %s957_s11, 1  ;;  %p958_p8 = scmp.ge.s32.totalorder %s1252_s10, 1 }
   0xe   : > { %s1565_s16 = scalar_select %p1347_p5, 1, 0 }
   0xf   : > { %s1566_s17 = scalar_select %p1351_p6, 1, 0 }
  0x10   : > { %p232_p9 = scmp.lt.s32.totalorder %s1252_s10, 3  ;;  %p1357_p10 = por %p225_p7, %p224_p4 }
  0x11   : > { %p1562_p11 = scmp.eq.s32.totalorder %s1329_s7, 0  ;;  %s1254_s20 = smov [#allocation4]  }
  0x12   : > { %s1567_s18 = scalar_select %p1357_p10, 1, 0 }
  0x13   : > { %p1362_p12 = pnand %p958_p8, %p232_p9  ;;  %s244_s21 = sshll.u32 %s1254_s20, 4  ;;  %s245_s21 = int_to_ptr.vmem [resolvable:$true] %s244_s21 }
  0x14   : > { %s1137_s25 = scalar_lea.hbm %s1555_s2, 512 }
  0x15   : > { %s1568_s19 = scalar_select %p1362_p12, 1, 0 }
  0x16   : > { %p1070_p13 = pneg %p1362_p12  ;;  %p1138_p1 = scmp.ne.s32.totalorder %s1555_s2, %s1137_s25 }
  0x17   : > { %p1144_p7 = scmp.lt.u32.totalorder %s1137_s25, %s1555_s2 }
  0x18   : > { %p1370_p0 = pnand %p1562_p11, %p1070_p13 }
  0x1a   : > { %p1139_p2 = pneg %p1370_p0 }
  0x1c   : > { %p1140_p3 = pnand %p1139_p2, %p1138_p1 }
  0x1e   : > { %p1141_p4 = pneg %p1140_p3 }
  0x20   : > { %p1146_p8 = pnand %p1144_p7, %p1141_p4 }
  0x22   : > { %1149 = shalt.err (!%p1146_p8)
}
  0x23   : > { %s1150_s13 = scalar_lea.vmem %s245_s21, 512  ;;  %p1158_p10 = scmp.lt.s32.totalorder %s245_s21, %s245_s21 }
  0x24   : > { %p1151_p9 = scmp.ne.s32.totalorder %s245_s21, %s1150_s13  ;;  %p1159_p6 = scmp.lt.s32.totalorder %s1150_s13, %s1150_s13 }
  0x26   : > { %p1153_p13 = pnand %p1151_p9, %p1139_p2  ;;  %p1160_p12 = por %p1159_p6, %p1158_p10 }
  0x28   : > { %p1154_p11 = pneg %p1153_p13 }
  0x2a   : > { %p1161_p5 = pnand %p1160_p12, %p1154_p11 }
  0x2c   : > { %1164 = shalt.err (!%p1161_p5)
}
  0x2d   : > { %s1255_s14 = smov 64   ;;  %s1256_s20 = smov 4  }
  0x2e   : > { %1073 = dma.hbm_to_vmem [thread:$0]  (!%p1370_p0), %s1555_s2, 512, %s245_s21, [#allocation5], %s1255_s14, %s1255_s14, %s1256_s20  }
  0x2f   : > { %p960_p1 = scmp.ge.s32.totalorder %s1252_s10, 2 }
  0x30   : > { %p1570_p2 = scmp.ne.s32.totalorder (!%p960_p1), %s1565_s16, 0 }
  0x31   : > { %269 = sbr.rel (%p960_p1) target bundleno = 70 (0x46), region = 40 }
  0x38   : > { %278 = sbr.rel (!%p1570_p2) target bundleno = 70 (0x46), region = 48  ;;  %s280_s25 = sand.u32 (%p1570_p2), 1, %s1248_s9  }
  0x39   : > { %s962_s26 = sshll.u32 (%p1570_p2), %s1252_s10, 2  ;;  %s961_s27 = sshll.u32 (%p1570_p2), %s280_s25, 6 }
  0x3a   : > { %s1400_s22 = scalar_lea.vmem (%p1570_p2), %s1554_s1, %s962_s26  ;;  %s282_s16 = scalar_lea.vmem (%p1570_p2), [#allocation3], %s961_s27 }
  0x3b   : > { %v300_v0 = vld [vmem:[%s1400_s22] sm:$0xf] (%p1570_p2)  ;;  %v302_v1 = vld [vmem:[%s1400_s22 + $0x8] sm:$0xf] (%p1570_p2)  ;;  %v304_v2 = vld [vmem:[%s1400_s22 + $0x10] sm:$0xf] (%p1570_p2) }
  0x3c   : > { %301 = vst [vmem:[%s282_s16] sm:$0xf] (%p1570_p2), %v300_v0  ;;  %303 = vst [vmem:[%s282_s16 + $0x4] sm:$0xf] (%p1570_p2), %v302_v1  ;;  %v306_v3 = vld [vmem:[%s1400_s22 + $0x18] sm:$0xf] (%p1570_p2) }
  0x3d   : > { %v308_v4 = vld [vmem:[%s1400_s22 + $0x20] sm:$0xf] (%p1570_p2)  ;;  %305 = vst [vmem:[%s282_s16 + $0x8] sm:$0xf] (%p1570_p2), %v304_v2  ;;  %307 = vst [vmem:[%s282_s16 + $0xc] sm:$0xf] (%p1570_p2), %v306_v3 }
  0x3e   : > { %309 = vst [vmem:[%s282_s16 + $0x10] sm:$0xf] (%p1570_p2), %v308_v4  ;;  %v310_v5 = vld [vmem:[%s1400_s22 + $0x28] sm:$0xf] (%p1570_p2)  ;;  %v312_v6 = vld [vmem:[%s1400_s22 + $0x30] sm:$0xf] (%p1570_p2) }
  0x3f   : > { %v314_v7 = vld [vmem:[%s1400_s22 + $0x38] sm:$0xf]  ;;  %311 = vst [vmem:[%s282_s16 + $0x14] sm:$0xf] %v310_v5  ;;  %313 = vst [vmem:[%s282_s16 + $0x18] sm:$0xf] %v312_v6 }
  0x40   : > { %315 = vst [vmem:[%s282_s16 + $0x1c] sm:$0xf] %v314_v7  ;;  %v316_v8 = vld [vmem:[%s1400_s22 + $0x40] sm:$0xf]  ;;  %v318_v9 = vld [vmem:[%s1400_s22 + $0x48] sm:$0xf] }
  0x41   : > { %v320_v10 = vld [vmem:[%s1400_s22 + $0x50] sm:$0xf]  ;;  %317 = vst [vmem:[%s282_s16 + $0x20] sm:$0xf] %v316_v8  ;;  %319 = vst [vmem:[%s282_s16 + $0x24] sm:$0xf] %v318_v9 }
  0x42   : > { %321 = vst [vmem:[%s282_s16 + $0x28] sm:$0xf] %v320_v10  ;;  %v322_v11 = vld [vmem:[%s1400_s22 + $0x58] sm:$0xf]  ;;  %v324_v12 = vld [vmem:[%s1400_s22 + $0x60] sm:$0xf] }
  0x43   : > { %v326_v13 = vld [vmem:[%s1400_s22 + $0x68] sm:$0xf]  ;;  %323 = vst [vmem:[%s282_s16 + $0x2c] sm:$0xf] %v322_v11  ;;  %325 = vst [vmem:[%s282_s16 + $0x30] sm:$0xf] %v324_v12 }
  0x44   : > { %327 = vst [vmem:[%s282_s16 + $0x34] sm:$0xf] %v326_v13  ;;  %v328_v14 = vld [vmem:[%s1400_s22 + $0x70] sm:$0xf]  ;;  %v330_v15 = vld [vmem:[%s1400_s22 + $0x78] sm:$0xf] }
  0x45   : > { %329 = vst [vmem:[%s282_s16 + $0x38] sm:$0xf] %v328_v14  ;;  %331 = vst [vmem:[%s282_s16 + $0x3c] sm:$0xf] %v330_v15 }
  0x46 PF: > { %p1571_p5 = scmp.ne.s32.totalorder %s1568_s19, 0 }
  0x47   : > { %s1421_s21 = sand.u32 (!%p1571_p5), 1, %s1244_s30   ;;  %p1572_p6 = scmp.eq.s32.totalorder (!%p1571_p5), %s1329_s7, 0 }
  0x48   : > { %389 = sbr.rel (%p1571_p5) target bundleno = 634 (0x27a), region = 89  ;;  %s964_s13 = sshll.u32 (!%p1571_p5), %s1421_s21, 6 }
  0x49   : > { %s1424_s14 = scalar_lea.vmem (!%p1571_p5), [#allocation3], %s964_s13 }
  0x4f   : > { %1210 = dma.done.wait (%p1572_p6), [#allocation5], 512   ;;  %p1573_p10 = pmov %p1572_p6 }
  0x50   : > { %v1257_v16 = vmov 0   ;;  %v1119_v17 = vld [vmem:[%s1424_s14] sm:$0xff]   ;;  %v1120_v18 = vld [vmem:[%s1424_s14 + $0x8] sm:$0xff]   ;;  %v1121_v19 = vld [vmem:[%s1424_s14 + $0x10] sm:$0xff]   ;;  %vm752_vm0 = vcmask 523264   ;;  %p431_p11 = scmp.lt.s32.totalorder %s1329_s7, 1 }
  0x51   : > { %1212 = vsyncadd (%p1573_p10), [#allocation5], 4294966784  ;;  %1117 = vset.pattern.permute.xlu0 %v1257_v16  ;;  %1118 = vset.pattern.permute.xlu1 %v1257_v16  ;;  %v1122_v20 = vld [vmem:[%s1424_s14 + $0x18] sm:$0xff]   ;;  %v1127_v21 = vld [vmem:[#allocation4] sm:$0xff]   ;;  %s852_s24 = sld [smem:[#allocation2]]  ;;  %s983_s25 = sshll.u32 %s1329_s7, 4 }
  0x52   : > { %1028 = vmatprep.subr.bf16.mxu0 %v1119_v17  ;;  %1044 = vmatprep.mubr.bf16.mxu0 %v1127_v21  ;;  %v1123_v22 = vld [vmem:[%s1424_s14 + $0x20] sm:$0xff]   ;;  %v519_v24 = vld [vmem:[%s1556_s3 + $0x10] sm:$0xff]  ;;  %v518_v25 = vld [vmem:[%s1556_s3 + $0x8] sm:$0xff]  ;;  %s430_s26 = scalar_lea.vmem [#allocation7], %s1421_s21  ;;  %s1509_s22 = scalar_lea.hbm %s1561_s8, %s983_s25 }
  0x53   : > { %1029 = vmatpush3.bf16.msra.mxu0 %v1119_v17  ;;  %v517_v23 = vld [vmem:[%s1556_s3] sm:$0xff]  ;;  %537 = vperm.xlu1 %1118, %v519_v24   ;;  %v520_v26 = vld [vmem:[%s1556_s3 + $0x18] sm:$0xff]  ;;  %v1124_v27 = vld [vmem:[%s1424_s14 + $0x28] sm:$0xff]   ;;  %s875_s27 = sshll.u32 %s430_s26, 4  ;;  %s863_s16 = scalar_lea.sflag [#allocation6], %s1421_s21  ;;  %s1511_s27 = int_to_ptr.vmem [resolvable:$true] %s875_s27 }
  0x54   : > { %1030 = vmatprep.subr.bf16.mxu0 %v1120_v18  ;;  %527 = vperm.xlu0 %1117, %v517_v23   ;;  %v521_v28 = vld [vmem:[%s1556_s3 + $0x20] sm:$0xff]  ;;  %v522_v29 = vld [vmem:[%s1556_s3 + $0x28] sm:$0xff]  ;;  %v1125_v30 = vld [vmem:[%s1424_s14 + $0x30] sm:$0xff]   ;;  %s1165_s13 = scalar_lea.vmem %s1511_s27, 16  ;;  %p1574_p0 = scmp.ne.s32.totalorder %s1566_s17, 0 }
  0x55   : > { %v523_v31 = vld [vmem:[%s1556_s3 + $0x30] sm:$0xff]  ;;  %v524_v32 = vld [vmem:[%s1556_s3 + $0x38] sm:$0xff]  ;;  %v718_v34 = vld [vmem:[%s1558_s5] sm:$0xff]  ;;  %p1166_p12 = scmp.ne.s32.totalorder %s1511_s27, %s1165_s13 }
  0x56   : > { %v1126_v33 = vld [vmem:[%s1424_s14 + $0x38] sm:$0xff]   ;;  %v719_v35 = vld [vmem:[%s1558_s5 + $0x8] sm:$0xff]  ;;  %v720_v37 = vld [vmem:[%s1558_s5 + $0x10] sm:$0xff] }
  0x57   : > { %1031 = vmatpush3.bf16.msra.mxu0 %v1120_v18  ;;  %542 = vperm.xlu1 %1118, %v520_v26   ;;  %v1128_v36 = vld [vmem:[#allocation4 + $0x8] sm:$0xff]   ;;  %v721_v38 = vld [vmem:[%s1558_s5 + $0x18] sm:$0xff]  ;;  %v1129_v39 = vld [vmem:[#allocation4 + $0x10] sm:$0xff]   ;;  %p1167_p3 = pnand %p1166_p12, %p1574_p0 }
  0x58   : > { %1032 = vmatprep.subr.bf16.mxu0 %v1121_v19  ;;  %532 = vperm.xlu0 %1117, %v518_v25   ;;  %v812_v40 = vld [vmem:[%s1559_s6] sm:$0xff]  ;;  %v813_v41 = vld [vmem:[%s1559_s6 + $0x8] sm:$0xff]  ;;  %v1130_v42 = vld [vmem:[#allocation4 + $0x18] sm:$0xff]  }
  0x59   : > { %v814_v43 = vld [vmem:[%s1559_s6 + $0x10] sm:$0xff]  ;;  %v815_v44 = vld [vmem:[%s1559_s6 + $0x18] sm:$0xff]  ;;  %v1131_v45 = vld [vmem:[%s1557_s4] sm:$0xff]   ;;  %p1168_p4 = pneg %p1167_p3 }
  0x5a   : > { %1060 = vmatprep.mubr.msk.bf16.mxu1 %vm752_vm0, %v1131_v45  ;;  %v1132_v18 = vld [vmem:[%s1557_s4 + $0x8] sm:$0xff]   ;;  %v1007_v25 = vld [vmem:[%s1424_s14 + $0x10] sm:$0xff]  }
  0x5b   : > { %1033 = vmatpush3.bf16.msra.mxu0 %v1121_v19  ;;  %552 = vperm.xlu1 %1118, %v522_v29   ;;  %v987_v19 = vld [vmem:[%s1424_s14] sm:$0xff]   ;;  %v997_v29 = vunpack.c.h.bf16 %v1007_v25 }
  0x5c   : > { %1034 = vmatprep.subr.bf16.mxu0 %v1122_v20  ;;  %547 = vperm.xlu0 %1117, %v521_v28   ;;  %v988_v21 = vunpack.c.l.bf16 %v987_v19  ;;  %v996_v28 = vunpack.c.l.bf16 %v1007_v25  ;;  %1217 = vmul.bf16.f32.vacc0 %v987_v19, %v987_v19 }
  0x5f   : > { %1035 = vmatpush3.bf16.msra.mxu0 %v1122_v20  ;;  %562 = vperm.xlu1 %1118, %v524_v32   ;;  %v1006_v20 = vld [vmem:[%s1424_s14 + $0x8] sm:$0xff]  }
  0x60   : > { %1036 = vmatprep.subr.bf16.mxu0 %v1123_v22  ;;  %557 = vperm.xlu0 %1117, %v523_v31   ;;  %v992_v23 = vunpack.c.l.bf16 %v1006_v20  ;;  %v993_v24 = vunpack.c.h.bf16 %v1006_v20  ;;  %1218 = vmac.bf16.f32.vacc0 %v1006_v20, %v1006_v20 }
  0x61   : > { %1219 = vmac.bf16.f32.vacc0 %v1007_v25, %v1007_v25 }
  0x62   : > { %v445_v26 = vadd.f32 %v992_v23, %v988_v21 }
  0x63   : > { %1037 = vmatpush3.bf16.msra.mxu0 %v1123_v22  ;;  %729 = vperm.xlu1 %1118, %v719_v35   ;;  %v989_v22 = vunpack.c.h.bf16 %v987_v19  ;;  %v1009_v35 = vld [vmem:[%s1424_s14 + $0x20] sm:$0xff]  }
  0x64   : > { %1038 = vmatprep.subr.bf16.mxu0 %v1124_v27  ;;  %724 = vperm.xlu0 %1117, %v718_v34   ;;  %v455_v31 = vadd.f32 %v996_v28, %v445_v26 }
  0x67   : > { %1039 = vmatpush3.bf16.msra.mxu0 %v1124_v27  ;;  %739 = vperm.xlu1 %1118, %v721_v38   ;;  %v446_v27 = vadd.f32 %v993_v24, %v989_v22  ;;  %v1004_v38 = vunpack.c.l.bf16 %v1009_v35 }
  0x68   : > { %1040 = vmatprep.subr.bf16.mxu0 %v1125_v30  ;;  %734 = vperm.xlu0 %1117, %v720_v37  }
  0x69   : > { %v456_v32 = vadd.f32 %v997_v29, %v446_v27 }
  0x6b   : > { %1041 = vmatpush3.bf16.msra.mxu0 %v1125_v30  ;;  %823 = vperm.xlu1 %1118, %v813_v41   ;;  %v1008_v30 = vld [vmem:[%s1424_s14 + $0x18] sm:$0xff]   ;;  %s432_s14 = scalar_select %p431_p11, %s1329_s7, 1 }
  0x6c   : > { %1042 = vmatprep.subr.bf16.mxu0 %v1126_v33  ;;  %818 = vperm.xlu0 %1117, %v812_v40   ;;  %v1001_v34 = vunpack.c.h.bf16 %v1008_v30  ;;  %1220 = vmac.bf16.f32.vacc0 %v1008_v30, %v1008_v30  ;;  %s1259_s7 = smov [#allocation7]  }
  0x6d   : > { %1221 = vmac.bf16.f32.vacc0 %v1009_v35, %v1009_v35  ;;  %s433_s23 = scalar_lea.vmem %s1553_s0, %s432_s14  ;;  %s1169_s14 = sshll.u32 %s1259_s7, 4  ;;  %s1170_s14 = int_to_ptr.vmem [resolvable:$false] %s1169_s14 }
  0x6e   : > { %v466_v37 = vadd.f32 %v1001_v34, %v456_v32  ;;  %v849_v32 = vld [vmem:[%s433_s23] sm:$0x1]  ;;  %s1171_s19 = scalar_lea.vmem %s1170_s14, 32  ;;  %p1172_p7 = scmp.lt.s32.totalorder %s1511_s27, %s1170_s14 }
  0x6f   : > { %1043 = vmatpush3.bf16.msra.mxu0 %v1126_v33  ;;  %833 = vperm.xlu1 %1118, %v815_v44   ;;  %v1000_v33 = vunpack.c.l.bf16 %v1008_v30  ;;  %p1173_p8 = scmp.lt.s32.totalorder %s1171_s19, %s1165_s13 }
  0x70   : > { %828 = vperm.xlu0 %1117, %v814_v43   ;;  %v1223_v43 = vmovacc.add.high.vacc0 }
  0x71   : > { %p1174_p9 = por %p1173_p8, %p1172_p7 }
  0x72   : > { %1045 = vmatmul.mubr.bf16.vlgmr.msra.gmra.mrb[0].mxu0 %v1128_v36  ;;  %v465_v36 = vadd.f32 %v1000_v33, %v455_v31 }
  0x73   : > { %1048 = vmatprep.mubr.bf16.mxu0 %v1129_v39  ;;  %v1005_v39 = vunpack.c.h.bf16 %v1009_v35  ;;  %p1175_p13 = pnand %p1174_p9, %p1168_p4 }
  0x74   : > { %v475_v40 = vadd.f32 %v1004_v38, %v465_v36 }
  0x75   : > { %v476_v41 = vadd.f32 %v1005_v39, %v466_v37  ;;  %v853_v37 = vstv %s852_s24 }
  0x7a   : > { %1049 = vmatmul.mubr.bf16.gmra.mrb[4].mxu0 %v1130_v42  ;;  %v1222_v42 = vmovacc.add.low.vacc0 }
  0x7c   : > { %v1224_v44 = vcombine.low %v1222_v42, %v1223_v43  ;;  %v1225_v45 = vcombine.high %v1222_v42, %v1223_v43 }
  0xd2   : > { %v538_v47 = vpop.permute.xlu1 %537 }
  0xd3   : > { %v528_v46 = vpop.permute.xlu0 %527 }
  0xd6   : > { %v543_v49 = vpop.permute.xlu1 %542 }
  0xd7   : > { %v533_v48 = vpop.permute.xlu0 %532 }
  0xda   : > { %v553_v58 = vpop.permute.xlu1 %552 }
  0xdb   : > { %v548_v53 = vpop.permute.xlu0 %547 }
  0xde   : > { %v563_v6 = vpop.permute.xlu1 %562 }
  0xdf   : > { %v558_v1 = vpop.permute.xlu0 %557 }
 0x145   : > { %v1046_v50 = vpop.f32.mrb[0].mxu0 }
 0x146   : > { %v680_v51 = vadd.f32 %v1046_v50, %v538_v47  ;;  %v671_v52 = vpop.f32.mrb[1].mxu0 }
 0x147   : > { %v672_v54 = vadd.f32 %v671_v52, %v528_v46  ;;  %v1047_v55 = vpop.f32.mrb[2].mxu0  ;;  %v1258_v46 = vmov 1935823168  }
 0x148   : > { %v683_v56 = vadd.f32 %v1047_v55, %v543_v49  ;;  %v674_v57 = vpop.f32.mrb[3].mxu0  ;;  %v704_v60 = vmax.f32 %v680_v51, 0.0  ;;  %v1226_v47 = vunpack.c.l.s4 %v1258_v46  ;;  %v1228_v49 = vlaneseq }
 0x149   : > { %v675_v59 = vadd.f32 %v674_v57, %v533_v48  ;;  %v702_v62 = vmax.f32 %v672_v54, 0.0  ;;  %v481_v54 = vmul.f32 %v475_v40, %v475_v40  ;;  %v482_v55 = vmul.f32 %v476_v41, %v476_v41 }
 0x14a   : > { %v705_v61 = vmax.f32 %v683_v56, 0.0  ;;  %v1227_v48 = vunpack.c.0.s8 %v1226_v47  ;;  %v1229_v50 = vshrl.u32 %v1228_v49, 7 }
 0x14b   : > { %v703_v63 = vmax.f32 %v675_v59, 0.0 }
 0x14c   : > { %v715_v0 = vpack.c.bf16 %v705_v61, %v704_v60  ;;  %v1230_v51 = vsub.s32 %v1227_v48, %v1229_v50  ;;  %v730_v60 = vpop.permute.xlu1 %729 }
 0x14d   : > { %v1050_v2 = vpop.f32.mrb[4].mxu0  ;;  %v714_v3 = vpack.c.bf16 %v703_v63, %v702_v62 }
 0x14e   : > { %v696_v4 = vadd.f32 %v1050_v2, %v558_v1  ;;  %v687_v5 = vpop.f32.mrb[5].mxu0  ;;  %v1231_v52 = vrot.slane %v1224_v44, %v1230_v51 }
 0x14f   : > { %v688_v7 = vadd.f32 %v687_v5, %v548_v53  ;;  %v1051_v8 = vpop.f32.mrb[6].mxu0  ;;  %1052 = vmatprep.subr.bf16.mxu1 %v714_v3  ;;  %v1237_v53 = vrot.slane %v1225_v45, %v1230_v51 }
 0x150   : > { %v699_v9 = vadd.f32 %v1051_v8, %v563_v6  ;;  %v690_v10 = vpop.f32.mrb[7].mxu0  ;;  %1053 = vmatpush3.bf16.msra.mxu1 %v714_v3  ;;  %v708_v12 = vmax.f32 %v696_v4, 0.0  ;;  %v483_v56 = vsub.f32 %v481_v54, %v1231_v52  ;;  %v740_v63 = vpop.permute.xlu1 %739 }
 0x151   : > { %v691_v11 = vadd.f32 %v690_v10, %v553_v58  ;;  %1054 = vmatprep.subr.bf16.mxu1 %v715_v0  ;;  %v706_v14 = vmax.f32 %v688_v7, 0.0  ;;  %v484_v57 = vsub.f32 %v482_v55, %v1237_v53  ;;  %v725_v58 = vpop.permute.xlu0 %724 }
 0x152   : > { %v709_v13 = vmax.f32 %v699_v9, 0.0 }
 0x153   : > { %v707_v15 = vmax.f32 %v691_v11, 0.0  ;;  %v485_v59 = vadd.f32 %v484_v57, %v483_v56 }
 0x154   : > { %v717_v16 = vpack.c.bf16 %v709_v13, %v708_v12  ;;  %1055 = vmatpush3.bf16.msra.mxu1 %v715_v0  ;;  %v824_v12 = vpop.permute.xlu1 %823 }
 0x155   : > { %v716_v17 = vpack.c.bf16 %v707_v15, %v706_v14  ;;  %v486_v61 = vrot.slane %v485_v59, 4  ;;  %v735_v62 = vpop.permute.xlu0 %734 }
 0x157   : > { %1056 = vmatprep.subr.bf16.mxu1 %v716_v17  ;;  %v487_v1 = vadd.f32 %v486_v61, %v485_v59 }
 0x158   : > { %1057 = vmatpush3.bf16.msra.mxu1 %v716_v17  ;;  %v834_v22 = vpop.permute.xlu1 %833 }
 0x159   : > { %1058 = vmatprep.subr.bf16.mxu1 %v717_v16  ;;  %v819_v6 = vpop.permute.xlu0 %818  ;;  %v488_v10 = vrot.slane %v487_v1, 2 }
 0x15b   : > { %v489_v17 = vadd.f32 %v488_v10, %v487_v1 }
 0x15c   : > { %1059 = vmatpush3.bf16.msra.mxu1 %v717_v16 }
 0x15d   : > { %v829_v19 = vpop.permute.xlu0 %828  ;;  %v490_v24 = vrot.slane %v489_v17, 1 }
 0x15f   : > { %1061 = vmatmul.mubr.msk.bf16.vlgmr.msra.gmra.mrb[0].mxu1 %vm752_vm0, %v1132_v18  ;;  %v491_v27 = vadd.f32 %v490_v24, %v489_v17 }
 0x161   : > { %v492_v30 = vmul.f32 0.5, %v491_v27 }
 0x163   : > { %v850_v35 = vadd.f32 %v849_v32, %v492_v30 }
 0x232   : > { %v1062_v0 = vpop.f32.mrb[0].mxu1 }
 0x233   : > { %v793_v2 = vpop.f32.mrb[1].mxu1  ;;  %v802_v3 = vadd.f32 %v1062_v0, %v735_v62 }
 0x234   : > { %v794_v4 = vadd.f32 %v793_v2, %v725_v58  ;;  %v1063_v5 = vpop.f32.mrb[2].mxu1 }
 0x235   : > { %v796_v7 = vpop.f32.mrb[3].mxu1  ;;  %v805_v9 = vadd.f32 %v1063_v5, %v740_v63  ;;  %v810_v13 = vmax.f32 %v802_v3, 0.0 }
 0x236   : > { %v808_v8 = vmax.f32 %v794_v4, 0.0  ;;  %v797_v11 = vadd.f32 %v796_v7, %v730_v60 }
 0x237   : > { %v811_v16 = vmax.f32 %v805_v9, 0.0  ;;  %v838_v20 = vmul.f32 %v829_v19, %v810_v13 }
 0x238   : > { %v809_v14 = vmax.f32 %v797_v11, 0.0  ;;  %v836_v15 = vmul.f32 %v819_v6, %v808_v8 }
 0x239   : > { %v839_v23 = vmul.f32 %v834_v22, %v811_v16 }
 0x23a   : > { %v837_v18 = vmul.f32 %v824_v12, %v809_v14 }
 0x23c   : > { %v840_v21 = vadd.f32 %v837_v18, %v836_v15 }
 0x23e   : > { %v841_v25 = vadd.f32 %v840_v21, %v838_v20 }
 0x240   : > { %v842_v26 = vadd.f32 %v841_v25, %v839_v23 }
 0x242   : > { %v843_v28 = vrot.slane %v842_v26, 4 }
 0x244   : > { %v844_v29 = vadd.f32 %v843_v28, %v842_v26 }
 0x246   : > { %v845_v31 = vrot.slane %v844_v29, 2 }
 0x248   : > { %v846_v33 = vadd.f32 %v845_v31, %v844_v29 }
 0x24a   : > { %v847_v34 = vrot.slane %v846_v33, 1 }
 0x24c   : > { %v848_v36 = vadd.f32 %v847_v34, %v846_v33 }
 0x24e   : > { %v851_v38 = vadd.f32 %v850_v35, %v848_v36 }
 0x250   : > { %v854_v39 = vadd.f32 %v853_v37, %v851_v38 }
 0x252   : > { %v982_v40 = vmul.f32 -1.442695, %v854_v39 }
 0x254   : > { %1133 = vpow2.f32 %v982_v40 }
 0x25e   : > { %v1134_v41 = vpop.eup %1133 }
 0x25f   : > { %v858_v42 = vadd.f32 1.0, %v1134_v41 }
 0x261   : > { %1135 = vrcp.f32 %v858_v42 }
 0x26b   : > { %v1136_v43 = vpop.eup %1135 }
 0x26c   : > { %861 = vst [vmem:[%s430_s26] sm:$0x1] %v1136_v43 }
 0x26d   : > { %1178 = shalt.err (!%p1175_p13)
}
 0x26e   : > { %s1179_s21 = scalar_lea.hbm %s1509_s22, 16  ;;  %s1183_s24 = scalar_lea.hbm %s1561_s8, 32 }
 0x26f   : > { %p1180_p2 = scmp.ne.s32.totalorder %s1509_s22, %s1179_s21  ;;  %p1184_p10 = scmp.lt.u32.totalorder %s1509_s22, %s1561_s8 }
 0x270   : > { %p1185_p11 = scmp.lt.u32.totalorder %s1183_s24, %s1179_s21  ;;  %p1187_p3 = scmp.lt.u32.totalorder %s1179_s21, %s1509_s22 }
 0x271   : > { %p1181_p5 = pnand %p1180_p2, %p1574_p0 }
 0x272   : > { %p1186_p12 = por %p1185_p11, %p1184_p10 }
 0x273   : > { %p1182_p6 = pneg %p1181_p5 }
 0x274   : > { %p1188_p4 = por %p1187_p3, %p1186_p12 }
 0x276   : > { %p1189_p7 = pnand %p1188_p4, %p1182_p6 }
 0x278   : > { %1192 = shalt.err (!%p1189_p7)
}
 0x279   : > { %1068 = dma.vmem_to_hbm [thread:$0]  (%p1574_p0), %s1511_s27, 16, %s1509_s22, %s863_s16  }
 0x27a PF: > { %s887_s28 = sand.u32 1, %s1240_s29   ;;  %p1575_p8 = scmp.ne.s32.totalorder %s1567_s18, 0 }
 0x27b   : > { %s888_s11 = scalar_lea.sflag [#allocation6], %s887_s28 }
 0x27c   : > { %p1075_p9 = pnand %p960_p1, %p1575_p8 }
 0x27e   : > { %1214 = dma.done.wait (!%p1075_p9), %s888_s11, 16  }
 0x27f   : > { %1216 = vsyncadd (!%p1075_p9), %s888_s11, 4294967280  ;;  %p20_p13 = scmp.ge.s32.totalorder %s1333_s12, 4   ;;  %s1576_s29 = smov %s1244_s30 }
 0x280   : > { %s1577_s30 = smov %s1248_s9  ;;  %s1578_s9 = smov %s1345_s15 }
 0x281   : > { %s1579_s10 = smov %s1333_s12  ;;  %22 = sbr.rel (!%p20_p13) target bundleno = 6 (0x6), region = 141 }
 0x288   :  { %892 = vsyncpa [#allocation5], 1 }
 0x289   :  { %894 = vsyncpa [#allocation5 + $0x1], 1 }
 0x28a   :  { %895 = vsyncpa [#allocation6], 1 }
 0x28b   :  { %897 = vsyncpa [#allocation6 + $0x1], 1 }

</bundles_post_ra>
